<compile_context>
chip_gen: v7x
topology: tpu7x:2x2x1
jax: 0.10.0
libtpu: 0.0.40
codegen_flags: <defaults>
</compile_context>

<pallas_src>
import jax
import jax.numpy as jnp
from jax.experimental import pallas as pl
from jax.experimental.pallas import tpu as pltpu


def _round_up(x: int, m: int) -> int:
    return ((x + m - 1) // m) * m


# ---------------------------------------------------------------------------
# Kernel body
# ---------------------------------------------------------------------------
def mlp_kernel(x_ref, w1_ref, b1_ref, w2_ref, b2_ref, out_ref):
    # x_ref:  [TM, D_in]   f32   (cast to bf16 in-kernel)
    # w1_ref: [D_in, H_p]  bf16  (VMEM-resident across all batch tiles)
    # b1_ref: [1, H_p]     f32
    # w2_ref: [H_p, D_out] bf16  (VMEM-resident)
    # b2_ref: [1, D_out]   f32
    # out_ref:[TM, D_out]  f32
    x = x_ref[...].astype(jnp.bfloat16)
    h = jnp.dot(x, w1_ref[...], preferred_element_type=jnp.float32)   # [TM, H_p]
    h = jnp.maximum(h + b1_ref[...], 0.0)                             # bias + ReLU (f32)
    y = jnp.dot(h.astype(jnp.bfloat16), w2_ref[...],
                preferred_element_type=jnp.float32)                   # [TM, D_out]
    out_ref[...] = y + b2_ref[...]


# ---------------------------------------------------------------------------
# One-time parameter preparation (hoisted out of the per-call path)
# ---------------------------------------------------------------------------
def prepare_params(w1, b1, w2, b2):
    """Pad hidden dim to a multiple of 128 and cast weights to bf16, once.

    w1: [D_in, H], b1: [1, H], w2: [H, D_out], b2: [1, D_out]  (f32)
    Returns (w1p, b1p, w2p, b2p) with H padded to H_p; zero padding preserves
    the math exactly (padded h columns are relu(0 + 0) = 0).
    """
    H = w1.shape[1]
    H_p = _round_up(H, 128)
    w1p = jnp.pad(w1, ((0, 0), (0, H_p - H))).astype(jnp.bfloat16)
    b1p = jnp.pad(b1, ((0, 0), (0, H_p - H))).astype(jnp.float32)
    w2p = jnp.pad(w2, ((0, H_p - H), (0, 0))).astype(jnp.bfloat16)
    b2p = b2.astype(jnp.float32)
    return w1p, b1p, w2p, b2p


def _vmem_budget_bytes() -> int:
    """Per-chip VMEM limit: ~75% of capacity, capped at 100 MiB."""
    try:
        cap = pltpu.get_tpu_info().vmem_capacity_bytes
    except Exception:
        cap = 64 * 1024 * 1024  # conservative (v7x per-TC)
    return min(int(cap * 0.75), 100 * 1024 * 1024)


def _vmem_footprint_bytes(TM, D_in, H_p, D_out) -> int:
    weights = 2 * D_in * H_p + 2 * H_p * D_out + 4 * H_p + 4 * D_out
    streams = 2 * (4 * TM * D_in) + 2 * (4 * TM * D_out)  # double-buffered x / out
    h_temp = 4 * TM * H_p                                  # f32 intermediate
    return weights + streams + h_temp


def _choose_tiling(B, D_in, H_p, D_out, vmem_limit, *, tm_max=1024, min_tiles=2):
    n_tiles = pl.cdiv(B, tm_max)
    if B >= 2 * 16:                     # enough rows to split across 2 TCs (v7x)
        n_tiles = max(n_tiles, min_tiles)
    TM = _round_up(pl.cdiv(B, n_tiles), 16)
    # Footprint guard: resident weights + f32 h temp + double-buffered streams.
    while TM > 16 and _vmem_footprint_bytes(TM, D_in, H_p, D_out) > vmem_limit:
        TM = _round_up(max(TM // 2, 16), 16)
    B_p = _round_up(B, TM)
    grid = B_p // TM
    return TM, B_p, grid


# ---------------------------------------------------------------------------
# Forward
# ---------------------------------------------------------------------------
def mlp_forward(x, w1p, b1p, w2p, b2p, *, tm_max=1024):
    """x: [B, D_in] f32; params from prepare_params (H already padded, bf16)."""
    B, D_in = x.shape
    H_p = w1p.shape[1]
    D_out = w2p.shape[1]

    vmem_limit = _vmem_budget_bytes()
    TM, B_p, grid = _choose_tiling(B, D_in, H_p, D_out, vmem_limit, tm_max=tm_max)

    # Only row padding (if any); no column pad, no dtype cast of x.
    xp = x if B_p == B else jnp.pad(x, ((0, B_p - B), (0, 0)))

    flops = 2 * B_p * (D_in * H_p + H_p * D_out)
    bytes_accessed = (B_p * D_in * 4            # x read (f32)
                      + w1p.size * 2 + w2p.size * 2
                      + b1p.size * 4 + b2p.size * 4
                      + B_p * D_out * 4)        # out write (f32)

    out = pl.pallas_call(
        mlp_kernel,
        out_shape=jax.ShapeDtypeStruct((B_p, D_out), jnp.float32),
        grid=(grid,),
        in_specs=[
            pl.BlockSpec((TM, D_in), lambda i: (i, 0)),      # x tile, pipelined
            pl.BlockSpec((D_in, H_p), lambda i: (0, 0)),     # w1 resident
            pl.BlockSpec((1, H_p), lambda i: (0, 0)),        # b1 resident
            pl.BlockSpec((H_p, D_out), lambda i: (0, 0)),    # w2 resident
            pl.BlockSpec((1, D_out), lambda i: (0, 0)),      # b2 resident
        ],
        out_specs=pl.BlockSpec((TM, D_out), lambda i: (i, 0)),
        compiler_params=pltpu.CompilerParams(
            dimension_semantics=("parallel",),               # megacore-shard batch
            vmem_limit_bytes=vmem_limit,
        ),
        cost_estimate=pl.CostEstimate(
            flops=flops, transcendentals=0, bytes_accessed=bytes_accessed),
    )(xp, w1p, b1p, w2p, b2p)

    return out if B_p == B else out[:B]


# ---------------------------------------------------------------------------
# Init (mirrors torch.nn.Linear's uniform(-1/sqrt(fan_in), +1/sqrt(fan_in)))
# ---------------------------------------------------------------------------
def init_params(key, d_in, hidden, d_out):
    k1, k2, k3, k4 = jax.random.split(key, 4)
    bound1 = 1.0 / jnp.sqrt(d_in)
    bound2 = 1.0 / jnp.sqrt(hidden)
    # Stored as (in, out) == transpose of PyTorch's (out, in) weight layout.
    w1 = jax.random.uniform(k1, (d_in, hidden), jnp.float32, -bound1, bound1)
    b1 = jax.random.uniform(k2, (1, hidden), jnp.float32, -bound1, bound1)
    w2 = jax.random.uniform(k3, (hidden, d_out), jnp.float32, -bound2, bound2)
    b2 = jax.random.uniform(k4, (1, d_out), jnp.float32, -bound2, bound2)
    return w1, b1, w2, b2


if __name__ == "__main__":
    # Small shapes consistent with the module: Model(input=32, hidden=64, output=16)
    B, D_in, HIDDEN, D_out = 8, 32, 64, 16

    key = jax.random.PRNGKey(0)
    kx, kp = jax.random.split(key)
    x = jax.random.normal(kx, (B, D_in), dtype=jnp.float32)
    w1, b1, w2, b2 = init_params(kp, D_in, HIDDEN, D_out)

    # One-time param preparation (pad H to 128 multiple, bf16 weights).
    params = prepare_params(w1, b1, w2, b2)

    out = mlp_forward(x, *params)
    out = jax.block_until_ready(out)

    # Pure-JAX f32 reference (same math as the torch forward). Tolerance is
    # loose because matmul operands run on the MXU in bf16 (f32 accumulation);
    # at this small fan-in (K<=64) 2e-2 is comfortably sufficient.
    ref = jnp.maximum(x @ w1 + b1, 0.0) @ w2 + b2
    assert out.shape == (B, D_out)
    assert jnp.allclose(out, ref, atol=2e-2, rtol=2e-2), (
        f"max abs err {jnp.max(jnp.abs(out - ref))}")

    print("KERNEL_OK")
</pallas_src>

<mosaic_0001>
module attributes {stable_mosaic.version = 11 : i64} {
  func.func @mlp_kernel(%arg0: i32, %arg1: memref<16x32xf32, #tpu.memory_space<vmem>>, %arg2: memref<32x128xbf16, #tpu.memory_space<vmem>>, %arg3: memref<1x128xf32, #tpu.memory_space<vmem>>, %arg4: memref<128x16xbf16, #tpu.memory_space<vmem>>, %arg5: memref<1x16xf32, #tpu.memory_space<vmem>>, %arg6: memref<16x16xf32, #tpu.memory_space<vmem>>) attributes {dimension_semantics = [#tpu.dimension_semantics<parallel>], iteration_bounds = array<i64: 1>, scalar_prefetch = 0 : i64, scratch_operands = 0 : i64, tpu.core_type = #tpu.core_type<tc>, window_params = [{transform_indices = @transform_0, window_bounds = array<i64: 16, 32>}, {pipeline_mode = #tpu.pipeline_mode<synchronous>, transform_indices = @transform_1, window_bounds = array<i64: 32, 128>}, {pipeline_mode = #tpu.pipeline_mode<synchronous>, transform_indices = @transform_2, window_bounds = array<i64: 1, 128>}, {pipeline_mode = #tpu.pipeline_mode<synchronous>, transform_indices = @transform_3, window_bounds = array<i64: 128, 16>}, {pipeline_mode = #tpu.pipeline_mode<synchronous>, transform_indices = @transform_4, window_bounds = array<i64: 1, 16>}, {transform_indices = @transform_5, window_bounds = array<i64: 16, 16>}]} {
    %c0 = arith.constant 0 : index
    %c0_0 = arith.constant 0 : index
    %0 = vector.load %arg1[%c0, %c0_0] : memref<16x32xf32, #tpu.memory_space<vmem>>, vector<16x32xf32>
    %1 = arith.truncf %0 : vector<16x32xf32> to vector<16x32xbf16>
    %c0_1 = arith.constant 0 : index
    %c0_2 = arith.constant 0 : index
    %2 = vector.load %arg2[%c0_1, %c0_2] : memref<32x128xbf16, #tpu.memory_space<vmem>>, vector<32x128xbf16>
    %cst = arith.constant dense<0.000000e+00> : vector<16x128xf32>
    %3 = tpu.matmul %1, %2, %cst {dimension_numbers = #tpu.dot_dimension_numbers<[1], [0], [0], [1], [0, 0, 1, 1], [], []>} : vector<16x32xbf16>, vector<32x128xbf16>, vector<16x128xf32> -> vector<16x128xf32>
    %c0_3 = arith.constant 0 : index
    %c0_4 = arith.constant 0 : index
    %4 = vector.load %arg3[%c0_3, %c0_4] : memref<1x128xf32, #tpu.memory_space<vmem>>, vector<1x128xf32>
    %5 = vector.broadcast %4 : vector<1x128xf32> to vector<16x128xf32>
    %6 = arith.addf %3, %5 : vector<16x128xf32>
    %cst_5 = arith.constant 0.000000e+00 : f32
    %7 = vector.broadcast %cst_5 : f32 to vector<16x128xf32>
    %8 = arith.maximumf %6, %7 : vector<16x128xf32>
    %9 = arith.truncf %8 : vector<16x128xf32> to vector<16x128xbf16>
    %c0_6 = arith.constant 0 : index
    %c0_7 = arith.constant 0 : index
    %10 = vector.load %arg4[%c0_6, %c0_7] : memref<128x16xbf16, #tpu.memory_space<vmem>>, vector<128x16xbf16>
    %cst_8 = arith.constant dense<0.000000e+00> : vector<16x16xf32>
    %11 = tpu.matmul %9, %10, %cst_8 {dimension_numbers = #tpu.dot_dimension_numbers<[1], [0], [0], [1], [0, 0, 1, 1], [], []>} : vector<16x128xbf16>, vector<128x16xbf16>, vector<16x16xf32> -> vector<16x16xf32>
    %c0_9 = arith.constant 0 : index
    %c0_10 = arith.constant 0 : index
    %12 = vector.load %arg5[%c0_9, %c0_10] : memref<1x16xf32, #tpu.memory_space<vmem>>, vector<1x16xf32>
    %13 = vector.broadcast %12 : vector<1x16xf32> to vector<16x16xf32>
    %14 = arith.addf %11, %13 : vector<16x16xf32>
    %c0_11 = arith.constant 0 : index
    %c0_12 = arith.constant 0 : index
    %15 = vector.load %arg6[%c0_11, %c0_12] : memref<16x16xf32, #tpu.memory_space<vmem>>, vector<16x16xf32>
    tpu.vector_store %arg6[%c0_11, %c0_12], %14 {strides = array<i32>} : memref<16x16xf32, #tpu.memory_space<vmem>>, vector<16x16xf32>,
    return
  }
  func.func @transform_0(%arg0: i32) -> (i32, i32) {
    %c0_i32 = arith.constant 0 : i32
    %c0_i32_0 = arith.constant 0 : i32
    return %arg0, %c0_i32 : i32, i32
  }
  func.func @transform_1(%arg0: i32) -> (i32, i32) {
    %c0_i32 = arith.constant 0 : i32
    %c0_i32_0 = arith.constant 0 : i32
    %c0_i32_1 = arith.constant 0 : i32
    return %c0_i32, %c0_i32_0 : i32, i32
  }
  func.func @transform_2(%arg0: i32) -> (i32, i32) {
    %c0_i32 = arith.constant 0 : i32
    %c0_i32_0 = arith.constant 0 : i32
    %c0_i32_1 = arith.constant 0 : i32
    return %c0_i32, %c0_i32_0 : i32, i32
  }
  func.func @transform_3(%arg0: i32) -> (i32, i32) {
    %c0_i32 = arith.constant 0 : i32
    %c0_i32_0 = arith.constant 0 : i32
    %c0_i32_1 = arith.constant 0 : i32
    return %c0_i32, %c0_i32_0 : i32, i32
  }
  func.func @transform_4(%arg0: i32) -> (i32, i32) {
    %c0_i32 = arith.constant 0 : i32
    %c0_i32_0 = arith.constant 0 : i32
    %c0_i32_1 = arith.constant 0 : i32
    return %c0_i32, %c0_i32_0 : i32, i32
  }
  func.func @transform_5(%arg0: i32) -> (i32, i32) {
    %c0_i32 = arith.constant 0 : i32
    %c0_i32_0 = arith.constant 0 : i32
    return %arg0, %c0_i32 : i32, i32
  }
}

</mosaic_0001>

<bundles_post_ra>
// kernel: tpu_custom_call.1
= control target key start
LH: loop header
LB: loop body
LE: loop exit
PB: predicated region body
PF: predicated region fallthrough
CT: control target
= control target key end

     0   :  { %v319_v1 = vmov 0.0   ;;  %vm320_vm0 = vmmov 0   ;;  %vm48_vm1 = vcmask 261120   ;;  %s408_s0 = inlined_call_operand.vmem [shape: f32[16,32], index: 0, kind: input, shape index: {}]   ;;  %s409_s1 = inlined_call_operand.vmem [shape: bf16[32,128], index: 1, kind: input, shape index: {}]   ;;  %s410_s2 = inlined_call_operand.vmem [shape: f32[1,128], index: 2, kind: input, shape index: {}]   ;;  %s411_s3 = inlined_call_operand.vmem [shape: bf16[128,16], index: 3, kind: input, shape index: {}]   ;;  %s412_s4 = inlined_call_operand.vmem [shape: f32[1,16], index: 4, kind: input, shape index: {}]   ;;  %s413_s5 = inlined_call_operand.hbm [shape: f32[16,16], index: 5, kind: output, shape index: {}]  }
   0x1   :  { %v285_v0 = vld [vmem:[%s409_s1] sm:$0xff]   ;;  %252 = vmatprep.subr.bf16.mxu0 %v319_v1  ;;  %v286_v2 = vld [vmem:[%s409_s1 + $0x8] sm:$0xff]   ;;  %260 = vmatprep.subr.bf16.mxu1 %v319_v1  ;;  %v289_v8 = vld [vmem:[%s411_s3 + $0x10] sm:$0xff]  }
   0x2   :  { %253 = vmatpush3.bf16.msra.mxu0 %v285_v0  ;;  %256 = vmatprep.mubr.msk.bf16.mxu0 %vm320_vm0, %v319_v1  ;;  %v22_v3 = vld [vmem:[%s408_s0] sm:$0xff]  ;;  %v23_v4 = vld [vmem:[%s408_s0 + $0x8] sm:$0xff] }
   0x3   :  { %254 = vmatprep.subr.bf16.mxu0 %v319_v1  ;;  %v287_v5 = vld [vmem:[%s411_s3] sm:$0xff]   ;;  %276 = vmatprep.mubr.msk.bf16.mxu1 %vm320_vm0, %v319_v1  ;;  %v24_v6 = vpack.c.bf16 %v23_v4, %v22_v3  ;;  %v288_v7 = vld [vmem:[%s411_s3 + $0x8] sm:$0xff]  }
   0x4   :  { %261 = vmatpush3.bf16.msra.mxu1 %v287_v5 }
   0x5   :  { %262 = vmatprep.subr.bf16.mxu1 %v319_v1 }
   0x6   :  { %255 = vmatpush3.bf16.msra.mxu0 %v286_v2 }
   0x8   :  { %263 = vmatpush3.bf16.msra.mxu1 %v288_v7 }
   0x9   :  { %257 = vmatmul.mubr.msk.bf16.vlgmr.msra.gmra.mrb[0].mxu0 %vm48_vm1, %v24_v6  ;;  %264 = vmatprep.subr.bf16.mxu1 %v319_v1 }
   0xa   :  { %10 = vsyncpa [#allocation3], 0  ;;  %v290_v9 = vld [vmem:[%s411_s3 + $0x18] sm:$0xff]   ;;  %v291_v10 = vld [vmem:[%s411_s3 + $0x20] sm:$0xff]   ;;  %vm208_vm2 = vcmask 130048  }
   0xb   :  { %v292_v11 = vld [vmem:[%s411_s3 + $0x28] sm:$0xff]   ;;  %v293_v12 = vld [vmem:[%s411_s3 + $0x30] sm:$0xff]   ;;  %v294_v13 = vld [vmem:[%s411_s3 + $0x38] sm:$0xff]   ;;  %s321_s3 = smov [#allocation2]  }
   0xc   :  { %265 = vmatpush3.bf16.msra.mxu1 %v289_v8  ;;  %v227_v14 = vld [vmem:[%s410_s2] ss:$0 sm:$0xff]  ;;  %s216_s19 = sshll.u32 %s321_s3, 4  ;;  %s217_s19 = int_to_ptr.vmem [resolvable:$true] %s216_s19 }
   0xd   :  { %266 = vmatprep.subr.bf16.mxu1 %v319_v1  ;;  %v231_v24 = vld [vmem:[%s412_s4] ss:$0 sm:$0xff]  ;;  %s295_s2 = scalar_lea.vmem %s217_s19, 256  ;;  %p300_p1 = scmp.lt.s32.totalorder %s217_s19, %s217_s19 }
   0xe   :  { %p296_p0 = scmp.ne.s32.totalorder %s217_s19, %s295_s2  ;;  %p301_p2 = scmp.lt.s32.totalorder %s295_s2, %s295_s2 }
  0x10   :  { %267 = vmatpush3.bf16.msra.mxu1 %v290_v9  ;;  %p302_p3 = por %p301_p2, %p300_p1 }
  0x11   :  { %268 = vmatprep.subr.bf16.mxu1 %v319_v1 }
  0x12   :  { %p303_p4 = pnand %p302_p3, %p296_p0 }
  0x14   :  { %269 = vmatpush3.bf16.msra.mxu1 %v291_v10 }
  0x15   :  { %270 = vmatprep.subr.bf16.mxu1 %v319_v1 }
  0x18   :  { %271 = vmatpush3.bf16.msra.mxu1 %v292_v11 }
  0x19   :  { %272 = vmatprep.subr.bf16.mxu1 %v319_v1 }
  0x1c   :  { %273 = vmatpush3.bf16.msra.mxu1 %v293_v12 }
  0x1d   :  { %274 = vmatprep.subr.bf16.mxu1 %v319_v1 }
  0x20   :  { %275 = vmatpush3.bf16.msra.mxu1 %v294_v13 }
  0xdc   :  { %v86_v15 = vpop.f32.mrb[0].mxu0 }
  0xdd   :  { %v87_v16 = vadd.f32 %v227_v14, %v86_v15  ;;  %v258_v17 = vpop.f32.mrb[1].mxu0 }
  0xde   :  { %v89_v18 = vpop.f32.mrb[2].mxu0 }
  0xdf   :  { %v90_v19 = vadd.f32 %v227_v14, %v89_v18  ;;  %v259_v20 = vpop.f32.mrb[3].mxu0  ;;  %v93_v21 = vmax.f32 %v87_v16, 0.0 }
  0xe1   :  { %v94_v22 = vmax.f32 %v90_v19, 0.0 }
  0xe3   :  { %v95_v23 = vpack.c.bf16 %v94_v22, %v93_v21 }
  0xe5   :  { %277 = vmatmul.mubr.bf16.vlgmr.msra.gmra.mrb[0].mxu1 %v95_v23 }
 0x1b8   :  { %v201_v25 = vpop.f32.mrb[0].mxu1 }
 0x1b9   :  { %v202_v26 = vadd.f32 %v231_v24, %v201_v25  ;;  %v278_v27 = vpop.f32.mrb[1].mxu1 }
 0x1ba   :  { %v204_v28 = vpop.f32.mrb[2].mxu1 }
 0x1bb   :  { %209 = vst.msk [vmem:[#allocation2] sm:$0xff] %vm208_vm2, %v202_v26  ;;  %v205_v29 = vadd.f32 %v231_v24, %v204_v28  ;;  %v279_v30 = vpop.f32.mrb[3].mxu1 }
 0x1bd   :  { %210 = vst.msk [vmem:[#allocation2 + $0x8] sm:$0xff] %vm208_vm2, %v205_v29 }
 0x1be   :  { %306 = shalt.err (!%p303_p4)
}
 0x1bf   :  { %s307_s21 = scalar_lea.hbm %s413_s5, 256 }
 0x1c0   :  { %p308_p5 = scmp.ne.s32.totalorder %s413_s5, %s307_s21  ;;  %p311_p6 = scmp.lt.u32.totalorder %s307_s21, %s413_s5 }
 0x1c2   :  { %p313_p7 = pnand %p311_p6, %p308_p5 }
 0x1c4   :  { %316 = shalt.err (!%p313_p7)
}
 0x1c5   :  { %s322_s26 = smov 128   ;;  %s323_s27 = smov 8  }
 0x1c6   :  { %222 = dma.vmem_to_hbm [thread:$0]  %s217_s19, 256, %s413_s5, [#allocation3], %s322_s26, %s322_s26, %s323_s27  }
 0x1c7   :  { %317 = dma.done.wait [#allocation3], 256  }
 0x1c8   :  { %318 = vsyncadd [#allocation3], 4294967040 }
 0x1c9   :  { %226 = vsyncpa [#allocation3], 1 }

</bundles_post_ra>
